<compile_context>
chip_gen: v7x
topology: tpu7x:2x2x1
jax: 0.10.0
libtpu: 0.0.40
codegen_flags: <defaults>
</compile_context>

<pallas_src>
import jax
import jax.numpy as jnp
from jax import lax
from jax.experimental import pallas as pl
from jax.experimental.pallas import tpu as pltpu

EPS = 1e-5


def _round_up(x, m):
    return -(-x // m) * m


def _padded_bytes(shape, itemsize):
    s = list(shape)
    if len(s) >= 1:
        s[-1] = _round_up(s[-1], 128)
    if len(s) >= 2:
        s[-2] = _round_up(s[-2], 8)
    n = 1
    for d in s:
        n *= d
    return n * itemsize


def _hw_budgets():
    """Returns (pipeline_budget_bytes, vmem_limit_cap_bytes), generation aware."""
    try:
        vmem_cap = int(pltpu.get_tpu_info().vmem_capacity_bytes)
    except Exception:
        vmem_cap = 64 << 20          # unknown chip / interpret: assume v7x (small)
    if vmem_cap >= (96 << 20):       # v5e / v6e: 128 MiB VMEM per TensorCore
        return 40 << 20, 64 << 20
    return 26 << 20, 48 << 20        # v7x: 64 MiB VMEM per TensorCore


def _bn_affine(pooled_f32, gamma_f32, beta_f32):
    # Training-mode BatchNorm1d: batch statistics over N, biased variance.
    mean = jnp.mean(pooled_f32, axis=0, keepdims=True)          # (1, TC)
    centered = pooled_f32 - mean
    var = jnp.mean(centered * centered, axis=0, keepdims=True)  # (1, TC)
    scale = lax.rsqrt(var + EPS) * gamma_f32
    return centered * scale + beta_f32


def _make_matmul_kernel(inv_hw, with_before):
    # inv_hw is a plain Python float (baked in as a literal, not captured).
    def kernel(x_ref, seg_ref, gamma_ref, beta_ref, *out_refs):
        if with_before:
            before_ref, after_ref = out_refs
        else:
            (after_ref,) = out_refs
        # Per-channel segmented spatial sum on the (otherwise idle) MXU:
        # (N, TC*HW) @ (TC*HW, TC) -> (N, TC), f32 accumulation.
        pooled = jnp.dot(x_ref[...], seg_ref[...],
                         preferred_element_type=jnp.float32) * inv_hw
        if with_before:
            before_ref[...] = pooled.astype(before_ref.dtype)
        out = _bn_affine(pooled,
                         gamma_ref[...].astype(jnp.float32),
                         beta_ref[...].astype(jnp.float32))
        after_ref[...] = out.astype(after_ref.dtype)
    return kernel


def _make_reduce_kernel(inv_hw, with_before):
    def kernel(x_ref, gamma_ref, beta_ref, *refs):
        if with_before:
            before_ref, after_ref, acc_ref = refs
        else:
            after_ref, acc_ref = refs

        step = pl.program_id(1)

        @pl.when(step == 0)
        def _init():
            acc_ref[...] = jnp.zeros_like(acc_ref)

        # Accumulate the spatial sum for this channel tile (upcast to f32;
        # important on v5e where the VPU has no bf16).
        x = x_ref[...].astype(jnp.float32)                 # (N, TC, ...) trailing spatial
        acc_ref[...] += jnp.sum(x, axis=tuple(range(2, x.ndim)))

        @pl.when(step == pl.num_programs(1) - 1)
        def _finalize():
            pooled = acc_ref[...] * inv_hw                 # avgpool + flatten
            if with_before:
                before_ref[...] = pooled.astype(before_ref.dtype)
            out = _bn_affine(pooled,
                             gamma_ref[...].astype(jnp.float32),
                             beta_ref[...].astype(jnp.float32))
            after_ref[...] = out.astype(after_ref.dtype)
    return kernel


def _plan_matmul(n, c, hw, itemsize, pipeline_budget):
    """Channel tile for the flattened MXU segmented-sum path, or None if it won't fit."""
    if c % 128 == 0 and c > 128:
        cands = [t for t in (128, 256) if c % t == 0]
        # Prefer >= 2 channel tiles (v7x: 2 TensorCores), then the larger tile.
        cands.sort(key=lambda t: (c // t >= 2, t), reverse=True)
    else:
        cands = [c]
    for tc in cands:
        x_bytes = _padded_bytes((n, tc * hw), itemsize)
        s_bytes = _padded_bytes((tc * hw, tc), itemsize)
        o_bytes = 2 * _padded_bytes((n, tc), itemsize)
        if 2 * (x_bytes + s_bytes + o_bytes) <= pipeline_budget:
            return tc
    return None


def _plan_reduce3d(n, c, hw, itemsize, pipeline_budget, channel_tile, spatial_tile):
    block_budget = pipeline_budget // 2     # the x block is double-buffered
    # Spatial tile (last dim must be a 128-multiple, or the full HW).
    if spatial_tile is not None:
        thw = spatial_tile
    elif hw % 128 != 0 or hw <= 2048:
        thw = hw
    else:
        cands = (2048, 1024, 512, 256) if itemsize < 4 else (2048, 1024, 512, 256, 128)
        thw = hw
        for t in cands:
            if hw % t == 0:
                thw = t
                break
    # Channel tile (multiple of 128, or the full C).
    if channel_tile is not None:
        tc = channel_tile
    elif c <= 128 or c % 128 != 0:
        tc = c
    else:
        tc = 128
        for cand in (2048, 1024, 512, 256, 128):
            if c % cand == 0 and n * cand * _round_up(thw, 128) * itemsize <= block_budget:
                tc = cand
                break
        # Prefer >= 2 channel tiles (v7x megacore) while staying lane-dense.
        if tc == c and c >= 256 and (c // 2) % 128 == 0:
            tc = c // 2
    return tc, thw


def _plan_reduce4d(n, c, h, w, itemsize, pipeline_budget, channel_tile, spatial_tile):
    block_budget = pipeline_budget // 2
    if channel_tile is not None:
        tc = channel_tile
    elif c <= 128 or c % 128 != 0:
        tc = c
    else:
        tc = 128
    if spatial_tile is not None:
        th = spatial_tile
    else:
        divisors = [d for d in range(1, h + 1) if h % d == 0]
        cands = sorted({d for d in divisors if d % 8 == 0} | {h}, reverse=True)
        th = cands[-1]
        for d in cands:
            if n * tc * d * _round_up(w, 128) * itemsize <= block_budget:
                th = d
                break
    return tc, th


def bnneck_forward(x, gamma, beta, loc="after", *,
                   channel_tile=None, spatial_tile=None, path=None):
    """BNNeck forward: AdaptiveAvgPool2d(1) -> flatten -> BatchNorm1d (train stats).

    Args:
      x: (N, C, H, W) feature map, or a list/tuple with a single such tensor
         (matching the PyTorch module's forward signature).
      gamma, beta: (C,) BN affine parameters.
      loc: 'after' -> [bn(pooled)]; 'both' -> [pooled, bn(pooled)].
      channel_tile / spatial_tile / path: optional overrides (testing).
    """
    if isinstance(x, (list, tuple)):
        assert len(x) == 1
        x = x[0]
    assert loc in ("after", "both")
    N, C, H, W = x.shape
    assert gamma.shape == (C,) and beta.shape == (C,)
    HW = H * W
    itemsize = jnp.dtype(x.dtype).itemsize
    out_dtype = x.dtype
    with_before = (loc == "both")
    inv_hw = float(1.0 / HW)    # Python float -> literal in the kernel, not a captured array

    pipeline_budget, vmem_cap = _hw_budgets()

    if path is None:
        if HW % 128 == 0:
            path = "reduce3d"
        else:
            path = "matmul" if _plan_matmul(N, C, HW, itemsize, pipeline_budget) else "reduce4d"
    assert path in ("matmul", "reduce3d", "reduce4d")

    g2 = gamma.reshape(1, C)
    b2 = beta.reshape(1, C)

    if path == "matmul":
        tc = channel_tile if channel_tile is not None else _plan_matmul(
            N, C, HW, itemsize, pipeline_budget)
        if tc is None:
            tc = C if (C % 128 != 0 or C <= 128) else 128
        assert C % tc == 0
        x_in = x.reshape(N, C * HW)
        # Block-diagonal ones matrix: seg[i, j] = 1 iff i // HW == j.
        seg = jnp.repeat(jnp.eye(tc, dtype=x.dtype), HW, axis=0)   # (tc*HW, tc)
        grid = (C // tc,)
        in_specs = [
            pl.BlockSpec((N, tc * HW), lambda c: (0, c)),
            pl.BlockSpec((tc * HW, tc), lambda c: (0, 0)),
            pl.BlockSpec((1, tc), lambda c: (0, c)),
            pl.BlockSpec((1, tc), lambda c: (0, c)),
        ]
        inputs = (x_in, seg, g2, b2)
        kernel = _make_matmul_kernel(inv_hw, with_before)
        scratch_shapes = []
        dim_sem = ("parallel",)
        out_idx = lambda c: (0, c)
        in_block_shapes = [(N, tc * HW), (tc * HW, tc), (1, tc), (1, tc)]
        flops = 2 * N * C * HW * tc
    elif path == "reduce3d":
        tc, thw = _plan_reduce3d(N, C, HW, itemsize, pipeline_budget,
                                 channel_tile, spatial_tile)
        assert C % tc == 0 and HW % thw == 0
        assert thw == HW or thw % 128 == 0
        x_in = x.reshape(N, C, HW)
        grid = (C // tc, HW // thw)
        in_specs = [
            pl.BlockSpec((N, tc, thw), lambda c, s: (0, c, s)),
            pl.BlockSpec((1, tc), lambda c, s: (0, c)),
            pl.BlockSpec((1, tc), lambda c, s: (0, c)),
        ]
        inputs = (x_in, g2, b2)
        kernel = _make_reduce_kernel(inv_hw, with_before)
        scratch_shapes = [pltpu.VMEM((N, tc), jnp.float32)]
        dim_sem = ("parallel", "arbitrary")
        out_idx = lambda c, s: (0, c)
        in_block_shapes = [(N, tc, thw), (1, tc), (1, tc)]
        flops = N * C * HW
    else:  # reduce4d fallback: keeps VMEM bounded for big, non-128-divisible HW
        tc, th = _plan_reduce4d(N, C, H, W, itemsize, pipeline_budget,
                                channel_tile, spatial_tile)
        assert C % tc == 0 and H % th == 0
        assert th == H or th % 8 == 0
        x_in = x
        grid = (C // tc, H // th)
        in_specs = [
            pl.BlockSpec((N, tc, th, W), lambda c, s: (0, c, s, 0)),
            pl.BlockSpec((1, tc), lambda c, s: (0, c)),
            pl.BlockSpec((1, tc), lambda c, s: (0, c)),
        ]
        inputs = (x_in, g2, b2)
        kernel = _make_reduce_kernel(inv_hw, with_before)
        scratch_shapes = [pltpu.VMEM((N, tc), jnp.float32)]
        dim_sem = ("parallel", "arbitrary")
        out_idx = lambda c, s: (0, c)
        in_block_shapes = [(N, tc, th, W), (1, tc), (1, tc)]
        flops = N * C * HW

    out_spec = pl.BlockSpec((N, tc), out_idx)
    out_struct = jax.ShapeDtypeStruct((N, C), out_dtype)
    if with_before:
        out_specs = (out_spec, out_spec)
        out_shape = (out_struct, out_struct)
        n_out = 2
    else:
        out_specs = out_spec
        out_shape = out_struct
        n_out = 1

    # VMEM accounting: 2x (double buffer) per in/out block + scratch + slack,
    # capped per generation (<= 48 MiB on v7x's 64 MiB VMEM, <= 64 MiB on v5e/v6e).
    need = 0
    for shp, arr in zip(in_block_shapes, inputs):
        need += 2 * _padded_bytes(shp, jnp.dtype(arr.dtype).itemsize)
    need += 2 * n_out * _padded_bytes((N, tc), jnp.dtype(out_dtype).itemsize)
    need += len(scratch_shapes) * _padded_bytes((N, tc), 4)
    vmem_limit = int(min(vmem_cap, max(32 << 20, need + (4 << 20))))

    bytes_accessed = (x_in.size * itemsize
                      + n_out * N * C * jnp.dtype(out_dtype).itemsize
                      + 2 * C * jnp.dtype(gamma.dtype).itemsize)
    if path == "matmul":
        bytes_accessed += inputs[1].size * itemsize
    cost = pl.CostEstimate(flops=int(flops), transcendentals=0,
                           bytes_accessed=int(bytes_accessed))

    out = pl.pallas_call(
        kernel,
        grid=grid,
        in_specs=in_specs,
        out_specs=out_specs,
        out_shape=out_shape,
        scratch_shapes=scratch_shapes,
        compiler_params=pltpu.CompilerParams(
            dimension_semantics=dim_sem,
            vmem_limit_bytes=vmem_limit,
        ),
        cost_estimate=cost,
    )(*inputs)

    if with_before:
        before, after = out
        return [before, after]
    return [out]


def _reference(x_nchw, gamma, beta):
    pooled = jnp.mean(x_nchw.astype(jnp.float32), axis=(2, 3))
    mean = jnp.mean(pooled, axis=0, keepdims=True)
    var = jnp.mean((pooled - mean) ** 2, axis=0, keepdims=True)
    after = (pooled - mean) / jnp.sqrt(var + EPS) * gamma[None, :] + beta[None, :]
    return pooled, after


def _check(outs, ref_before, ref_after, with_before, tag):
    if with_before:
        before, after = outs
        assert jnp.allclose(before.astype(jnp.float32), ref_before,
                            atol=1e-4, rtol=1e-4), f"{tag}: before mismatch"
    else:
        (after,) = outs
    assert jnp.allclose(after.astype(jnp.float32), ref_after,
                        atol=2e-3, rtol=2e-3), f"{tag}: after mismatch"


if __name__ == "__main__":
    key = jax.random.PRNGKey(0)
    k1, k2, k3, k4, k5 = jax.random.split(key, 5)

    # Case 1: small module-spirit shape, 128-multiple HW -> reduce3d path.
    N, C, H, W = 2, 4, 16, 16
    x = jax.random.normal(k1, (N, C, H, W), dtype=jnp.float32)
    gamma = jnp.ones((C,), jnp.float32)      # init_weights(): weight = 1
    beta = jnp.zeros((C,), jnp.float32)      # init_weights(): bias = 0
    rb, ra = _reference(x, gamma, beta)
    outs = jax.block_until_ready(bnneck_forward([x], gamma, beta, loc="both"))
    _check(outs, rb, ra, True, "case1-both")
    outs = jax.block_until_ready(bnneck_forward(x, gamma, beta, loc="after"))
    _check(outs, rb, ra, False, "case1-after")

    # Case 2: classic ReID head (HW=7*7=49, not a 128-multiple) -> lane-dense
    # flattened path with the MXU segmented sum.
    N2, C2, H2, W2 = 4, 256, 7, 7
    x2 = jax.random.normal(k2, (N2, C2, H2, W2), dtype=jnp.float32)
    g2 = 1.0 + 0.1 * jax.random.normal(k3, (C2,), jnp.float32)
    b2 = 0.1 * jax.random.normal(k4, (C2,), jnp.float32)
    rb2, ra2 = _reference(x2, g2, b2)
    outs2 = jax.block_until_ready(bnneck_forward(x2, g2, b2, loc="both"))
    _check(outs2, rb2, ra2, True, "case2-matmul")

    # Case 3: tiled reduce3d path (multiple channel tiles + spatial accumulation).
    N3, C3, H3, W3 = 2, 256, 16, 16
    x3 = jax.random.normal(k5, (N3, C3, H3, W3), dtype=jnp.float32)
    rb3, ra3 = _reference(x3, g2, b2)
    outs3 = jax.block_until_ready(
        bnneck_forward(x3, g2, b2, loc="both", channel_tile=128, spatial_tile=128))
    _check(outs3, rb3, ra3, True, "case3-reduce3d-tiled")

    # Case 4: 4-D fallback path (non-128-multiple HW, bounded-VMEM row tiling).
    N4, C4, H4, W4 = 2, 128, 16, 12
    x4 = jax.random.normal(k1, (N4, C4, H4, W4), dtype=jnp.float32)
    g4 = 1.0 + 0.1 * jax.random.normal(k2, (C4,), jnp.float32)
    b4 = 0.1 * jax.random.normal(k3, (C4,), jnp.float32)
    rb4, ra4 = _reference(x4, g4, b4)
    outs4 = jax.block_until_ready(
        bnneck_forward(x4, g4, b4, loc="both", spatial_tile=8, path="reduce4d"))
    _check(outs4, rb4, ra4, True, "case4-reduce4d")

    print("KERNEL_OK")
</pallas_src>

<mosaic_0001>
module attributes {stable_mosaic.version = 11 : i64} {
  func.func @kernel(%arg0: i32, %arg1: i32, %arg2: memref<2x4x256xf32, #tpu.memory_space<vmem>>, %arg3: memref<1x4xf32, #tpu.memory_space<vmem>>, %arg4: memref<1x4xf32, #tpu.memory_space<vmem>>, %arg5: memref<2x4xf32, #tpu.memory_space<vmem>>, %arg6: memref<2x4xf32, #tpu.memory_space<vmem>>, %arg7: memref<2x4xf32, #tpu.memory_space<vmem>>) attributes {dimension_semantics = [#tpu.dimension_semantics<parallel>, #tpu.dimension_semantics<arbitrary>], iteration_bounds = array<i64: 1, 1>, scalar_prefetch = 0 : i64, scratch_operands = 1 : i64, tpu.core_type = #tpu.core_type<tc>, window_params = [{transform_indices = @transform_0, window_bounds = array<i64: 2, 4, 256>}, {transform_indices = @transform_1, window_bounds = array<i64: 1, 4>}, {transform_indices = @transform_2, window_bounds = array<i64: 1, 4>}, {transform_indices = @transform_3, window_bounds = array<i64: 2, 4>}, {transform_indices = @transform_4, window_bounds = array<i64: 2, 4>}]} {
    %c0_i32 = arith.constant 0 : i32
    %0 = arith.cmpi eq, %arg1, %c0_i32 : i32
    %1 = arith.extui %0 : i1 to i32
    %c0_i32_0 = arith.constant 0 : i32
    %2 = arith.cmpi ne, %1, %c0_i32_0 : i32
    scf.if %2 {
      %cst_9 = arith.constant 0.000000e+00 : f32
      %11 = vector.broadcast %cst_9 : f32 to vector<2x4xf32>
      %c0_10 = arith.constant 0 : index
      %c0_11 = arith.constant 0 : index
      %12 = vector.load %arg7[%c0_10, %c0_11] : memref<2x4xf32, #tpu.memory_space<vmem>>, vector<2x4xf32>
      tpu.vector_store %arg7[%c0_10, %c0_11], %11 {strides = array<i32>} : memref<2x4xf32, #tpu.memory_space<vmem>>, vector<2x4xf32>,
    } else {
    }
    %c0 = arith.constant 0 : index
    %c0_1 = arith.constant 0 : index
    %c0_2 = arith.constant 0 : index
    %3 = vector.load %arg2[%c0, %c0_1, %c0_2] : memref<2x4x256xf32, #tpu.memory_space<vmem>>, vector<2x4x256xf32>
    %c0_3 = arith.constant 0 : index
    %c0_4 = arith.constant 0 : index
    %4 = vector.load %arg7[%c0_3, %c0_4] : memref<2x4xf32, #tpu.memory_space<vmem>>, vector<2x4xf32>
    %cst = arith.constant dense<0.000000e+00> : vector<2x4xf32>
    %5 = vector.multi_reduction <add>, %3, %cst [2] : vector<2x4x256xf32> to vector<2x4xf32>
    %6 = arith.addf %4, %5 : vector<2x4xf32>
    %c0_5 = arith.constant 0 : index
    %c0_6 = arith.constant 0 : index
    %7 = vector.load %arg7[%c0_5, %c0_6] : memref<2x4xf32, #tpu.memory_space<vmem>>, vector<2x4xf32>
    tpu.vector_store %arg7[%c0_5, %c0_6], %6 {strides = array<i32>} : memref<2x4xf32, #tpu.memory_space<vmem>>, vector<2x4xf32>,
    %c0_i32_7 = arith.constant 0 : i32
    %8 = arith.cmpi eq, %arg1, %c0_i32_7 : i32
    %9 = arith.extui %8 : i1 to i32
    %c0_i32_8 = arith.constant 0 : i32
    %10 = arith.cmpi ne, %9, %c0_i32_8 : i32
    scf.if %10 {
      %c0_9 = arith.constant 0 : index
      %c0_10 = arith.constant 0 : index
      %11 = vector.load %arg7[%c0_9, %c0_10] : memref<2x4xf32, #tpu.memory_space<vmem>>, vector<2x4xf32>
      %cst_11 = arith.constant 3.906250e-03 : f32
      %12 = vector.broadcast %cst_11 : f32 to vector<2x4xf32>
      %13 = arith.mulf %11, %12 : vector<2x4xf32>
      %c0_12 = arith.constant 0 : index
      %c0_13 = arith.constant 0 : index
      %14 = vector.load %arg5[%c0_12, %c0_13] : memref<2x4xf32, #tpu.memory_space<vmem>>, vector<2x4xf32>
      tpu.vector_store %arg5[%c0_12, %c0_13], %13 {strides = array<i32>} : memref<2x4xf32, #tpu.memory_space<vmem>>, vector<2x4xf32>,
      %c0_14 = arith.constant 0 : index
      %c0_15 = arith.constant 0 : index
      %15 = vector.load %arg3[%c0_14, %c0_15] : memref<1x4xf32, #tpu.memory_space<vmem>>, vector<1x4xf32>
      %c0_16 = arith.constant 0 : index
      %c0_17 = arith.constant 0 : index
      %16 = vector.load %arg4[%c0_16, %c0_17] : memref<1x4xf32, #tpu.memory_space<vmem>>, vector<1x4xf32>
      %cst_18 = arith.constant dense<0.000000e+00> : vector<4xf32>
      %17 = vector.multi_reduction <add>, %13, %cst_18 [0] : vector<2x4xf32> to vector<4xf32>
      %18 = vector.shape_cast %17 : vector<4xf32> to vector<1x4xf32>
      %cst_19 = arith.constant 2.000000e+00 : f32
      %19 = vector.broadcast %cst_19 : f32 to vector<1x4xf32>
      %20 = arith.divf %18, %19 : vector<1x4xf32>
      %21 = vector.broadcast %20 : vector<1x4xf32> to vector<2x4xf32>
      %22 = arith.subf %13, %21 : vector<2x4xf32>
      %23 = arith.mulf %22, %22 : vector<2x4xf32>
      %cst_20 = arith.constant dense<0.000000e+00> : vector<4xf32>
      %24 = vector.multi_reduction <add>, %23, %cst_20 [0] : vector<2x4xf32> to vector<4xf32>
      %25 = vector.shape_cast %24 : vector<4xf32> to vector<1x4xf32>
      %cst_21 = arith.constant 2.000000e+00 : f32
      %26 = vector.broadcast %cst_21 : f32 to vector<1x4xf32>
      %27 = arith.divf %25, %26 : vector<1x4xf32>
      %cst_22 = arith.constant 9.99999974E-6 : f32
      %28 = vector.broadcast %cst_22 : f32 to vector<1x4xf32>
      %29 = arith.addf %27, %28 : vector<1x4xf32>
      %30 = math.rsqrt %29 : vector<1x4xf32>
      %31 = arith.mulf %30, %15 : vector<1x4xf32>
      %32 = vector.broadcast %31 : vector<1x4xf32> to vector<2x4xf32>
      %33 = arith.mulf %22, %32 : vector<2x4xf32>
      %34 = vector.broadcast %16 : vector<1x4xf32> to vector<2x4xf32>
      %35 = arith.addf %33, %34 : vector<2x4xf32>
      %c0_23 = arith.constant 0 : index
      %c0_24 = arith.constant 0 : index
      %36 = vector.load %arg6[%c0_23, %c0_24] : memref<2x4xf32, #tpu.memory_space<vmem>>, vector<2x4xf32>
      tpu.vector_store %arg6[%c0_23, %c0_24], %35 {strides = array<i32>} : memref<2x4xf32, #tpu.memory_space<vmem>>, vector<2x4xf32>,
    } else {
    }
    return
  }
  func.func @transform_0(%arg0: i32, %arg1: i32) -> (i32, i32, i32) {
    %c0_i32 = arith.constant 0 : i32
    %c0_i32_0 = arith.constant 0 : i32
    return %c0_i32, %arg0, %arg1 : i32, i32, i32
  }
  func.func @transform_1(%arg0: i32, %arg1: i32) -> (i32, i32) {
    %c0_i32 = arith.constant 0 : i32
    %c0_i32_0 = arith.constant 0 : i32
    return %c0_i32, %arg0 : i32, i32
  }
  func.func @transform_2(%arg0: i32, %arg1: i32) -> (i32, i32) {
    %c0_i32 = arith.constant 0 : i32
    %c0_i32_0 = arith.constant 0 : i32
    return %c0_i32, %arg0 : i32, i32
  }
  func.func @transform_3(%arg0: i32, %arg1: i32) -> (i32, i32) {
    %c0_i32 = arith.constant 0 : i32
    %c0_i32_0 = arith.constant 0 : i32
    return %c0_i32, %arg0 : i32, i32
  }
  func.func @transform_4(%arg0: i32, %arg1: i32) -> (i32, i32) {
    %c0_i32 = arith.constant 0 : i32
    %c0_i32_0 = arith.constant 0 : i32
    return %c0_i32, %arg0 : i32, i32
  }
}

</mosaic_0001>

<bundles_post_ra>
// kernel: tpu_custom_call.1
= control target key start
LH: loop header
LB: loop body
LE: loop exit
PB: predicated region body
PF: predicated region fallthrough
CT: control target
= control target key end

     0   :  { %10 = vsyncpa [#allocation4], 0  ;;  %s310_s0 = inlined_call_operand.hbm [shape: f32[2,4,256], index: 0, kind: input, shape index: {}]   ;;  %s311_s1 = inlined_call_operand.vmem [shape: f32[1,4], index: 1, kind: input, shape index: {}]   ;;  %s312_s2 = inlined_call_operand.vmem [shape: f32[1,4], index: 2, kind: input, shape index: {}]   ;;  %s313_s3 = inlined_call_operand.hbm [shape: f32[2,4], index: 3, kind: output, shape index: {0}]   ;;  %s314_s4 = inlined_call_operand.hbm [shape: f32[2,4], index: 4, kind: output, shape index: {1}]  }
   0x1   :  { %11 = vsyncpa [#allocation5], 0 }
   0x2   :  { %12 = vsyncpa [#allocation8], 0  ;;  %s231_s15 = smov [#allocation3]   ;;  %s159_s19 = scalar_lea.hbm %s310_s0, 256 }
   0x3   :  { %s18_s16 = sshll.u32 %s231_s15, 4  ;;  %p160_p0 = scmp.ne.s32.totalorder %s310_s0, %s159_s19  ;;  %s19_s16 = int_to_ptr.vmem [resolvable:$true] %s18_s16 }
   0x4   :  { %p163_p1 = scmp.lt.u32.totalorder %s159_s19, %s310_s0 }
   0x6   :  { %p165_p2 = pnand %p163_p1, %p160_p0 }
   0x8   :  { %168 = shalt.err (!%p165_p2)
}
   0x9   :  { %s169_s24 = scalar_lea.vmem %s19_s16, 256  ;;  %p174_p4 = scmp.lt.s32.totalorder %s19_s16, %s19_s16 }
   0xa   :  { %p170_p3 = scmp.ne.s32.totalorder %s19_s16, %s169_s24  ;;  %p175_p5 = scmp.lt.s32.totalorder %s169_s24, %s169_s24 }
   0xc   :  { %p176_p6 = por %p175_p5, %p174_p4 }
   0xe   :  { %p177_p7 = pnand %p176_p6, %p170_p3 }
  0x10   :  { %180 = shalt.err (!%p177_p7)
}
  0x11   :  { %s232_s25 = smov 128   ;;  %s233_s26 = smov 8  }
  0x12   :  { %24 = dma.hbm_to_vmem [thread:$0]  %s310_s0, 256, %s19_s16, [#allocation4], %s232_s25, %s232_s25, %s233_s26  }
  0x13   :  { %225 = dma.done.wait [#allocation4], 256  }
  0x14   :  { %226 = vsyncadd [#allocation4], 4294967040  ;;  %vm47_vm0 = vcmask 1043456   ;;  %v38_v0 = vld [vmem:[#allocation3] sm:$0xff]  ;;  %v39_v1 = vld [vmem:[#allocation3 + $0x8] sm:$0xff]  ;;  %vm36_vm1 = vcmask 25600   ;;  %v60_v11 = vlaneseq }
  0x15   :  { %v43_v2 = vcombine.high %v38_v0, %v38_v0  ;;  %v48_v3 = vsel %vm47_vm0, %v38_v0, 0.0  ;;  %v44_v4 = vcombine.high %v39_v1, %v39_v1  ;;  %v53_v6 = vsel %vm47_vm0, %v39_v1, 0.0  ;;  %s235_s0 = smov [#allocation6]  }
  0x16   :  { %v234_v10 = vmov 0.0   ;;  %v61_v12 = vand.u32 127, %v60_v11  ;;  %v63_v13 = vshrl.u32 %v60_v11, 7  ;;  %vm70_vm2 = vcmask 1041409   ;;  %s125_s29 = sshll.u32 %s235_s0, 4  ;;  %s126_s29 = int_to_ptr.vmem [resolvable:$true] %s125_s29 }
  0x17   :  { %v49_v5 = vsel %vm47_vm0, %v43_v2, 0.0  ;;  %v54_v7 = vsel %vm47_vm0, %v44_v4, 0.0  ;;  %37 = vst.msk [vmem:[#allocation2] sm:$0x3] %vm36_vm1, %v234_v10  ;;  %s181_s30 = scalar_lea.vmem %s126_s29, 32  ;;  %p186_p9 = scmp.lt.s32.totalorder %s126_s29, %s126_s29 }
  0x18   :  { %v50_v8 = vadd.f32 %v49_v5, %v48_v3  ;;  %v55_v9 = vadd.f32 %v54_v7, %v53_v6  ;;  %v64_v15 = vsub.s32 %v61_v12, %v63_v13  ;;  %p182_p8 = scmp.ne.s32.totalorder %s126_s29, %s181_s30  ;;  %p187_p10 = scmp.lt.s32.totalorder %s181_s30, %s181_s30 }
  0x1a   :  { %51 = vadd.xlane.f32.xlu0 %v50_v8  ;;  %p188_p11 = por %p187_p10, %p186_p9 }
  0x1c   :  { %p189_p12 = pnand %p188_p11, %p182_p8 }
  0x1e   :  { %56 = vadd.xlane.f32.xlu0 %v55_v9  ;;  %v40_v18 = vld [vmem:[#allocation2] sm:$0x3] }
  0xa7   :  { %v52_v14 = vpop.xlane.xlu0 %51 }
  0xa8   :  { %v65_v17 = vrot.slane %v52_v14, %v64_v15 }
  0xab   :  { %v57_v16 = vpop.xlane.xlu0 %56 }
  0xac   :  { %v69_v19 = vrot.slane %v57_v16, %v64_v15 }
  0xae   :  { %v71_v20 = vsel %vm70_vm2, %v69_v19, %v65_v17 }
  0xaf   :  { %v73_v21 = vadd.f32 %v71_v20, %v40_v18 }
  0xb1   :  { %75 = vst.msk [vmem:[#allocation2] sm:$0x3] %vm36_vm1, %v73_v21 }
  0xb8   :  { %v79_v22 = vld [vmem:[#allocation2] sm:$0x3] }
  0xb9   :  { %v80_v23 = vmul.f32 0.00390625, %v79_v22 }
  0xbb   :  { %81 = vst.msk [vmem:[#allocation6] sm:$0x3] %vm36_vm1, %v80_v23  ;;  %v84_v24 = vsel %vm36_vm1, %v80_v23, 0.0 }
  0xbc   :  { %v85_v25 = vrot.slane %v84_v24, 4 }
  0xbd   :  { %192 = shalt.err (!%p189_p12)
}
  0xbe   :  { %s193_s7 = scalar_lea.hbm %s313_s3, 32 }
  0xbf   :  { %p194_p13 = scmp.ne.s32.totalorder %s313_s3, %s193_s7  ;;  %p197_p0 = scmp.lt.u32.totalorder %s193_s7, %s313_s3 }
  0xc1   :  { %p199_p1 = pnand %p197_p0, %p194_p13 }
  0xc3   :  { %202 = shalt.err (!%p199_p1)
}
  0xc4   :  { %128 = dma.vmem_to_hbm [thread:$0]  %s126_s29, 32, %s313_s3, [#allocation5]   ;;  %v86_v26 = vadd.f32 %v85_v25, %v84_v24  ;;  %v82_v43 = vld [vmem:[%s311_s1] sm:$0x1]  ;;  %v108_v44 = vsub.s32 0, %v63_v13 }
  0xc5   :  { %v148_v48 = vld [vmem:[%s312_s2] ss:$0 sm:$0xff]  ;;  %s236_s17 = smov [#allocation7]  }
  0xc6   :  { %v87_v27 = vrot.slane %v86_v26, 2  ;;  %s135_s18 = sshll.u32 %s236_s17, 4  ;;  %s136_s18 = int_to_ptr.vmem [resolvable:$true] %s135_s18 }
  0xc7   :  { %s203_s19 = scalar_lea.vmem %s136_s18, 32  ;;  %p208_p3 = scmp.lt.s32.totalorder %s136_s18, %s136_s18 }
  0xc8   :  { %v88_v28 = vadd.f32 %v87_v27, %v86_v26  ;;  %p204_p2 = scmp.ne.s32.totalorder %s136_s18, %s203_s19  ;;  %p209_p4 = scmp.lt.s32.totalorder %s203_s19, %s203_s19 }
  0xca   :  { %v89_v29 = vrot.slane %v88_v28, 1  ;;  %p210_p5 = por %p209_p4, %p208_p3 }
  0xcc   :  { %v90_v30 = vadd.f32 %v89_v29, %v88_v28  ;;  %p211_p6 = pnand %p210_p5, %p204_p2 }
  0xce   :  { %v92_v31 = vmul.f32 0.5, %v90_v30 }
  0xd0   :  { %v93_v32 = vsub.f32 %v80_v23, %v92_v31 }
  0xd2   :  { %v94_v33 = vmul.f32 %v93_v32, %v93_v32 }
  0xd4   :  { %v95_v34 = vsel %vm36_vm1, %v94_v33, 0.0 }
  0xd5   :  { %v96_v35 = vrot.slane %v95_v34, 4 }
  0xd7   :  { %v97_v36 = vadd.f32 %v96_v35, %v95_v34 }
  0xd9   :  { %v98_v37 = vrot.slane %v97_v36, 2 }
  0xdb   :  { %v99_v38 = vadd.f32 %v98_v37, %v97_v36 }
  0xdd   :  { %v100_v39 = vrot.slane %v99_v38, 1 }
  0xdf   :  { %v101_v40 = vadd.f32 %v100_v39, %v99_v38 }
  0xe1   :  { %v102_v41 = vmul.f32 0.5, %v101_v40 }
  0xe3   :  { %v103_v42 = vadd.f32 1e-05, %v102_v41 }
  0xe5   :  { %157 = vrsqrt.f32 %v103_v42 }
  0xef   :  { %v158_v45 = vpop.eup %157 }
  0xf0   :  { %v105_v46 = vmul.f32 %v158_v45, %v82_v43 }
  0xf2   :  { %v109_v47 = vrot.slane %v105_v46, %v108_v44 }
  0xf4   :  { %v110_v49 = vmul.f32 %v109_v47, %v93_v32 }
  0xf6   :  { %v117_v50 = vadd.f32 %v148_v48, %v110_v49 }
  0xf8   :  { %118 = vst.msk [vmem:[#allocation7] sm:$0x3] %vm36_vm1, %v117_v50 }
  0xf9   :  { %214 = shalt.err (!%p211_p6)
}
  0xfa   :  { %s215_s21 = scalar_lea.hbm %s314_s4, 32 }
  0xfb   :  { %p216_p7 = scmp.ne.s32.totalorder %s314_s4, %s215_s21  ;;  %p219_p8 = scmp.lt.u32.totalorder %s215_s21, %s314_s4 }
  0xfd   :  { %p221_p9 = pnand %p219_p8, %p216_p7 }
  0xff   :  { %224 = shalt.err (!%p221_p9)
}
 0x100   :  { %138 = dma.vmem_to_hbm [thread:$0]  %s136_s18, 32, %s314_s4, [#allocation8]  }
 0x101   :  { %227 = dma.done.wait [#allocation5], 32  }
 0x102   :  { %228 = vsyncadd [#allocation5], 4294967264 }
 0x103   :  { %229 = dma.done.wait [#allocation8], 32  }
 0x104   :  { %230 = vsyncadd [#allocation8], 4294967264 }
 0x105   :  { %145 = vsyncpa [#allocation4], 1 }
 0x106   :  { %146 = vsyncpa [#allocation5], 1 }
 0x107   :  { %147 = vsyncpa [#allocation8], 1 }

</bundles_post_ra>
